<compile_context>
chip_gen: v5e
topology: v5e:2x2
jax: 0.10.0
libtpu: 0.0.40
codegen_flags: <defaults>
</compile_context>

<pallas_src>
import math

import jax
import jax.numpy as jnp
from jax import lax
from jax.experimental import pallas as pl
from jax.experimental.pallas import tpu as pltpu


# Scoped-VMEM budget: leave headroom under v7x's 64 MiB physical VMEM; can be raised to
# ~100 MiB on v5e/v6e (128 MiB physical) if larger tiles are wanted.
_VMEM_LIMIT_BYTES = 48 * 1024 * 1024


# ---------------------------------------------------------------------------
# Kernel 1: fused QKV projection   y = x @ [Wq*s | Wk | Wv] + [bq*s | bk | bv]
#   (operands arrive already in the MXU dtype; no per-tile casts in-kernel)
# ---------------------------------------------------------------------------
def _qkv_proj_kernel(x_ref, w_ref, b_ref, o_ref):
    acc = jnp.dot(x_ref[...], w_ref[...], preferred_element_type=jnp.float32)
    o_ref[...] = (acc + b_ref[...]).astype(o_ref.dtype)


def _pick_row_tile(m, cap=512):
    """Largest row tile <= cap that divides m (keeps VMEM bounded at real BERT sizes)."""
    if m <= cap:
        return m
    for t in range(cap, 0, -8):
        if m % t == 0:
            return t
    return m


def fused_qkv_projection(x2d, wqkv, bqkv, out_dtype):
    """x2d: (M, K), wqkv: (K, 3H), bqkv: (1, 3H) -> (M, 3H) in out_dtype."""
    M, K = x2d.shape
    N = wqkv.shape[1]
    TM = _pick_row_tile(M)
    return pl.pallas_call(
        _qkv_proj_kernel,
        out_shape=jax.ShapeDtypeStruct((M, N), out_dtype),
        grid=(M // TM,),
        in_specs=[
            pl.BlockSpec((TM, K), lambda i: (i, 0)),
            pl.BlockSpec((K, N), lambda i: (0, 0)),
            pl.BlockSpec((1, N), lambda i: (0, 0)),
        ],
        out_specs=pl.BlockSpec((TM, N), lambda i: (i, 0)),
        compiler_params=pltpu.CompilerParams(
            dimension_semantics=("parallel",),
            vmem_limit_bytes=_VMEM_LIMIT_BYTES,
        ),
    )(x2d, wqkv, bqkv)


# ---------------------------------------------------------------------------
# Kernel 2: per-(batch, head) attention with prob override
#   scores = q_scaled @ k^T + attention_mask        (1/sqrt(D) pre-folded into Wq/bq)
#   probs  = softmax(scores)                         (dropout is eval-mode identity)
#   probs  = where(override_mask, override, probs)   (mask zero-padded outside [:L,:L])
#   ctx    = probs @ v
# ---------------------------------------------------------------------------
def _make_attn_kernel(mxu_dtype):
    # contract the D axes of q and k: q @ k^T without an explicit transpose
    dn = (((1,), (1,)), ((), ()))

    def kernel(q_ref, k_ref, v_ref, am_ref, ovr_ref, ovrm_ref, ctx_ref, probs_ref):
        s = lax.dot_general(
            q_ref[...], k_ref[...],
            dimension_numbers=dn,
            preferred_element_type=jnp.float32,
        )                                       # (S, S) f32
        s = s + am_ref[...]                     # (1, S) additive mask broadcasts over rows

        # numerically-stable softmax; divide -> EUP reciprocal + one Newton step (~f32 exact)
        m = jnp.max(s, axis=-1, keepdims=True)
        e = jnp.exp(s - m)
        denom = jnp.sum(e, axis=-1, keepdims=True)
        inv = pl.reciprocal(denom, approx=True)
        inv = inv * (2.0 - denom * inv)
        probs = e * inv                         # (S, S) f32

        # dropout: identity (eval mode). head_mask: None in this configuration.

        # override fully in registers; single lane-dense full-tile store; matmul from registers
        patched = jnp.where(ovrm_ref[...] != 0, ovr_ref[...], probs)
        probs_ref[...] = patched.astype(probs_ref.dtype)

        ctx = jnp.dot(patched.astype(mxu_dtype), v_ref[...],
                      preferred_element_type=jnp.float32)
        ctx_ref[...] = ctx.astype(ctx_ref.dtype)

    return kernel


def attention_core(q, k, v, amask, ovr, ovrm, mxu_dtype=jnp.float32,
                   probs_dtype=jnp.float32):
    """q/k/v: (B, NH, S, D) in mxu_dtype; amask: (B, 1, S) f32; ovr: (B, NH, S, S) f32;
    ovrm: (B, NH, S, S) int8 -> ctx (B, NH, S, D) f32, probs (B, NH, S, S) probs_dtype."""
    B, NH, S, D = q.shape

    head_block = lambda: pl.BlockSpec((None, None, S, D), lambda b, h: (b, h, 0, 0))
    ss_block = lambda: pl.BlockSpec((None, None, S, S), lambda b, h: (b, h, 0, 0))

    ctx, probs = pl.pallas_call(
        _make_attn_kernel(mxu_dtype),
        out_shape=(
            jax.ShapeDtypeStruct((B, NH, S, D), jnp.float32),
            jax.ShapeDtypeStruct((B, NH, S, S), probs_dtype),
        ),
        grid=(B, NH),
        in_specs=[
            head_block(),                                      # q
            head_block(),                                      # k
            head_block(),                                      # v
            pl.BlockSpec((None, 1, S), lambda b, h: (b, 0, 0)),  # additive attention mask
            ss_block(),                                        # override values
            ss_block(),                                        # override mask (int8)
        ],
        out_specs=(
            head_block(),                                      # per-head context
            ss_block(),                                        # patched attention probs
        ),
        compiler_params=pltpu.CompilerParams(
            # both axes write disjoint output blocks -> both shard across TensorCores
            dimension_semantics=("parallel", "parallel"),
            vmem_limit_bytes=_VMEM_LIMIT_BYTES,
        ),
    )(q, k, v, amask, ovr, ovrm)
    return ctx, probs


# ---------------------------------------------------------------------------
# Module wrapper (glue only: weight fusion, scale folding, layout, mask padding)
# ---------------------------------------------------------------------------
def bert_attention_override(hidden_states, params, attn_override, attn_override_mask,
                            attention_mask=None, num_heads=4, mxu_dtype=jnp.float32,
                            probs_dtype=jnp.float32):
    B, S, H = hidden_states.shape
    D = H // num_heads
    scale = 1.0 / math.sqrt(D)

    # Fold 1/sqrt(D) into the query projection (offline-foldable in a real model) so the
    # attention kernel never rescales the (S, S) scores on the VPU.
    wqkv = jnp.concatenate([params["wq"] * scale, params["wk"], params["wv"]], axis=1)  # (H, 3H)
    bqkv = jnp.concatenate([params["bq"] * scale, params["bk"], params["bv"]], axis=1)  # (1, 3H)

    # bf16 operands are cast ONCE here (HBM-side), not per tile inside the kernels.
    x2d = hidden_states.reshape(B * S, H).astype(mxu_dtype)
    wqkv = wqkv.astype(mxu_dtype)
    bqkv = bqkv.astype(jnp.float32)

    qkv = fused_qkv_projection(x2d, wqkv, bqkv, out_dtype=mxu_dtype)        # (B*S, 3H)

    # split into per-head slabs: (B, S, 3, NH, D) -> (3, B, NH, S, D)  (thin XLA layout glue)
    qkv = qkv.reshape(B, S, 3, num_heads, D).transpose(2, 0, 3, 1, 4)
    q, k, v = qkv[0], qkv[1], qkv[2]

    # additive attention mask at a broadcastable (B, 1, S) shape
    if attention_mask is None:
        amask = jnp.zeros((B, 1, S), jnp.float32)
    else:
        amask = jnp.broadcast_to(attention_mask.astype(jnp.float32),
                                 (B, 1, 1, S)).reshape(B, 1, S)

    # Override value/mask: mask is zero-padded outside [:L, :L] so the in-register where()
    # reproduces the reference's sub-block assignment exactly.  In the documented case
    # (override_seq_len == seq_len) this is a no-op with no extra HBM traffic.
    L = attn_override_mask.shape[-1]
    ovr = attn_override.astype(jnp.float32)
    ovrm = attn_override_mask.astype(jnp.int8)
    if L < S:
        pad = ((0, 0), (0, 0), (0, S - L), (0, S - L))
        ovr = jnp.pad(ovr, pad)
        ovrm = jnp.pad(ovrm, pad)     # zeros -> never override outside the [:L, :L] block

    ctx, probs = attention_core(q, k, v, amask, ovr, ovrm, mxu_dtype, probs_dtype)

    context = ctx.transpose(0, 2, 1, 3).reshape(B, S, H)      # (B, NH, S, D) -> (B, S, H)
    return context, probs   # output_attentions=True


# ---------------------------------------------------------------------------
# Pure-JAX reference for verification
# ---------------------------------------------------------------------------
def _reference(hidden_states, params, attn_override, attn_override_mask,
               attention_mask, num_heads):
    B, S, H = hidden_states.shape
    D = H // num_heads

    def proj(w, b):
        y = hidden_states @ w + b[0]
        return y.reshape(B, S, num_heads, D).transpose(0, 2, 1, 3)

    q = proj(params["wq"], params["bq"])
    k = proj(params["wk"], params["bk"])
    v = proj(params["wv"], params["bv"])
    scores = jnp.einsum("bhqd,bhkd->bhqk", q, k) / math.sqrt(D)
    if attention_mask is not None:
        scores = scores + attention_mask
    probs = jax.nn.softmax(scores, axis=-1)
    L = attn_override_mask.shape[-1]
    patch = jnp.where(attn_override_mask, attn_override, probs[:, :, :L, :L])
    probs = probs.at[:, :, :L, :L].set(patch)
    ctx = jnp.einsum("bhqk,bhkd->bhqd", probs, v)
    context = ctx.transpose(0, 2, 1, 3).reshape(B, S, H)
    return context, probs


if __name__ == "__main__":
    B, S, H, NH = 2, 8, 32, 4
    L = 6  # override_seq_len < seq_len, exercising the [:L, :L] slice-assignment semantics

    key = jax.random.PRNGKey(0)
    ks = jax.random.split(key, 10)

    params = {
        "wq": jax.random.normal(ks[0], (H, H), jnp.float32) * 0.05,
        "bq": jax.random.normal(ks[1], (1, H), jnp.float32) * 0.01,
        "wk": jax.random.normal(ks[2], (H, H), jnp.float32) * 0.05,
        "bk": jax.random.normal(ks[3], (1, H), jnp.float32) * 0.01,
        "wv": jax.random.normal(ks[4], (H, H), jnp.float32) * 0.05,
        "bv": jax.random.normal(ks[5], (1, H), jnp.float32) * 0.01,
    }

    hidden_states = jax.random.normal(ks[6], (B, S, H), jnp.float32)

    # additive attention mask (BERT convention): last position of batch 1 masked out
    attention_mask = jnp.zeros((B, 1, 1, S), jnp.float32).at[1, 0, 0, -1].set(-10000.0)

    attn_override = jax.random.uniform(ks[7], (B, NH, L, L), jnp.float32)
    attn_override_mask = jax.random.bernoulli(ks[8], 0.3, (B, NH, L, L))

    ref_ctx, ref_probs = _reference(
        hidden_states, params, attn_override, attn_override_mask, attention_mask, NH
    )

    # -- accuracy path: f32 MXU operands --------------------------------------------------------
    context, probs = bert_attention_override(
        hidden_states, params, attn_override, attn_override_mask,
        attention_mask=attention_mask, num_heads=NH, mxu_dtype=jnp.float32,
    )
    context = jax.block_until_ready(context)
    probs = jax.block_until_ready(probs)
    assert context.shape == (B, S, H) and probs.shape == (B, NH, S, S)
    assert jnp.allclose(context, ref_ctx, atol=1e-3, rtol=1e-3)
    assert jnp.allclose(probs, ref_probs, atol=1e-3, rtol=1e-3)

    # -- throughput path: bf16 MXU operands (recommended for v6e/v7x); f32 accumulate/softmax ---
    #    (probs_dtype=jnp.bfloat16 additionally halves the dominant probs HBM write on v5e)
    ctx_bf16, probs_bf16 = bert_attention_override(
        hidden_states, params, attn_override, attn_override_mask,
        attention_mask=attention_mask, num_heads=NH, mxu_dtype=jnp.bfloat16,
    )
    ctx_bf16 = jax.block_until_ready(ctx_bf16)
    probs_bf16 = jax.block_until_ready(probs_bf16)
    assert jnp.allclose(ctx_bf16, ref_ctx, atol=1e-1, rtol=1e-1)
    assert jnp.allclose(probs_bf16, ref_probs, atol=1e-1, rtol=1e-1)

    print("KERNEL_OK")
</pallas_src>

<mosaic_0001>
module attributes {stable_mosaic.version = 11 : i64} {
  func.func @_qkv_proj_kernel(%arg0: i32, %arg1: memref<16x32xf32, #tpu.memory_space<vmem>>, %arg2: memref<32x96xf32, #tpu.memory_space<vmem>>, %arg3: memref<1x96xf32, #tpu.memory_space<vmem>>, %arg4: memref<16x96xf32, #tpu.memory_space<vmem>>) attributes {dimension_semantics = [#tpu.dimension_semantics<parallel>], iteration_bounds = array<i64: 1>, scalar_prefetch = 0 : i64, scratch_operands = 0 : i64, tpu.core_type = #tpu.core_type<tc>, window_params = [{transform_indices = @transform_0, window_bounds = array<i64: 16, 32>}, {pipeline_mode = #tpu.pipeline_mode<synchronous>, transform_indices = @transform_1, window_bounds = array<i64: 32, 96>}, {pipeline_mode = #tpu.pipeline_mode<synchronous>, transform_indices = @transform_2, window_bounds = array<i64: 1, 96>}, {transform_indices = @transform_3, window_bounds = array<i64: 16, 96>}]} {
    %c0 = arith.constant 0 : index
    %c0_0 = arith.constant 0 : index
    %0 = vector.load %arg1[%c0, %c0_0] : memref<16x32xf32, #tpu.memory_space<vmem>>, vector<16x32xf32>
    %c0_1 = arith.constant 0 : index
    %c0_2 = arith.constant 0 : index
    %1 = vector.load %arg2[%c0_1, %c0_2] : memref<32x96xf32, #tpu.memory_space<vmem>>, vector<32x96xf32>
    %cst = arith.constant dense<0.000000e+00> : vector<16x96xf32>
    %2 = tpu.matmul %0, %1, %cst {dimension_numbers = #tpu.dot_dimension_numbers<[1], [0], [0], [1], [0, 0, 1, 1], [], []>} : vector<16x32xf32>, vector<32x96xf32>, vector<16x96xf32> -> vector<16x96xf32>
    %c0_3 = arith.constant 0 : index
    %c0_4 = arith.constant 0 : index
    %3 = vector.load %arg3[%c0_3, %c0_4] : memref<1x96xf32, #tpu.memory_space<vmem>>, vector<1x96xf32>
    %4 = vector.broadcast %3 : vector<1x96xf32> to vector<16x96xf32>
    %5 = arith.addf %2, %4 : vector<16x96xf32>
    %c0_5 = arith.constant 0 : index
    %c0_6 = arith.constant 0 : index
    %6 = vector.load %arg4[%c0_5, %c0_6] : memref<16x96xf32, #tpu.memory_space<vmem>>, vector<16x96xf32>
    tpu.vector_store %arg4[%c0_5, %c0_6], %5 {strides = array<i32>} : memref<16x96xf32, #tpu.memory_space<vmem>>, vector<16x96xf32>,
    return
  }
  func.func @transform_0(%arg0: i32) -> (i32, i32) {
    %c0_i32 = arith.constant 0 : i32
    %c0_i32_0 = arith.constant 0 : i32
    return %arg0, %c0_i32 : i32, i32
  }
  func.func @transform_1(%arg0: i32) -> (i32, i32) {
    %c0_i32 = arith.constant 0 : i32
    %c0_i32_0 = arith.constant 0 : i32
    %c0_i32_1 = arith.constant 0 : i32
    return %c0_i32, %c0_i32_0 : i32, i32
  }
  func.func @transform_2(%arg0: i32) -> (i32, i32) {
    %c0_i32 = arith.constant 0 : i32
    %c0_i32_0 = arith.constant 0 : i32
    %c0_i32_1 = arith.constant 0 : i32
    return %c0_i32, %c0_i32_0 : i32, i32
  }
  func.func @transform_3(%arg0: i32) -> (i32, i32) {
    %c0_i32 = arith.constant 0 : i32
    %c0_i32_0 = arith.constant 0 : i32
    return %arg0, %c0_i32 : i32, i32
  }
}

</mosaic_0001>

<bundles_post_ra>
// kernel: tpu_custom_call.1
= control target key start
LH: loop header
LB: loop body
LE: loop exit
PB: predicated region body
PF: predicated region fallthrough
CT: control target
= control target key end

     0   :  { %8 = vsyncpa [#allocation3], 0  ;;  %s246_s0 = inlined_call_operand.hbm [shape: f32[16,32], index: 0, kind: input, shape index: {}]   ;;  %s247_s1 = inlined_call_operand.hbm [shape: f32[32,96], index: 1, kind: input, shape index: {}]   ;;  %s248_s2 = inlined_call_operand.vmem [shape: f32[1,96], index: 2, kind: input, shape index: {}]   ;;  %s249_s3 = inlined_call_operand.hbm [shape: f32[16,96], index: 3, kind: output, shape index: {}]  }
   0x1   :  { %9 = vsyncpa [#allocation6], 0 }
   0x2   :  { %10 = vsyncpa [#allocation4], 0  ;;  %s15_s14 = sshll.u32 %s246_s0, 4  ;;  %s200_s15 = smov [#allocation2]   ;;  %s16_s14 = int_to_ptr.hbm [resolvable:$true] %s15_s14 }
   0x3   :  { %s17_s16 = sshll.u32 %s200_s15, 4  ;;  %s28_s19 = sshll.u32 %s247_s1, 4  ;;  %s18_s16 = int_to_ptr.vmem [resolvable:$true] %s17_s16  ;;  %s29_s19 = int_to_ptr.hbm [resolvable:$true] %s28_s19 }
   0x4   :  { %s201_s20 = smov 128   ;;  %s202_s21 = smov 8  }
   0x5   :  { %23 = dma.hbm_to_vmem [thread:$0]  %s16_s14, 256, %s18_s16, [#allocation3], %s201_s20, %s201_s20, %s202_s21  }
   0x6   :  { %s203_s22 = smov [#allocation5]  }
   0x7   :  { %s30_s23 = sshll.u32 %s203_s22, 4  ;;  %s31_s23 = int_to_ptr.vmem [resolvable:$true] %s30_s23 }
   0x8   :  { %36 = dma.hbm_to_vmem [thread:$0]  %s29_s19, 512, %s31_s23, [#allocation6], %s201_s20, %s201_s20, %s202_s21  }
   0x9   :  { %194 = dma.done.wait [#allocation3], 256  }
   0xa   :  { %195 = vsyncadd [#allocation3], 4294967040 }
   0xb   :  { %196 = dma.done.wait [#allocation6], 512  }
   0xc   :  { %197 = vsyncadd [#allocation6], 4294966784  ;;  %v52_v0 = vld [vmem:[#allocation5 + $0x18] sm:$0xff]  ;;  %v51_v1 = vld [vmem:[#allocation5 + $0x10] sm:$0xff]  ;;  %vm57_vm0 = vcmask 261120   ;;  %s204_s24 = smov [#allocation7]  }
   0xd   :  { %76 = vmatpush.msra.mxu0 %v52_v0  ;;  %112 = vmatpush.msra.mxu1 %v52_v0  ;;  %v50_v2 = vld [vmem:[#allocation5 + $0x8] sm:$0xff]  ;;  %v49_v3 = vld [vmem:[#allocation5] sm:$0xff]  ;;  %v47_v4 = vld [vmem:[#allocation2] sm:$0xff]  ;;  %s94_s25 = sshll.u32 %s204_s24, 4  ;;  %s96_s28 = sshll.u32 %s249_s3, 4  ;;  %vm87_vm1 = vcmask 785408   ;;  %s95_s25 = int_to_ptr.vmem [resolvable:$true] %s94_s25  ;;  %s97_s28 = int_to_ptr.hbm [resolvable:$true] %s96_s28 }
   0xe   :  { %v48_v5 = vld [vmem:[#allocation2 + $0x8] sm:$0xff]  ;;  %v121_v6 = vld [vmem:[%s248_s2] ss:$0 sm:$0xff] }
   0xf   :  { %77 = vmatpush.msra.mxu0 %v51_v1  ;;  %113 = vmatpush.msra.mxu1 %v51_v1 }
  0x11   :  { %78 = vmatpush.msra.mxu0 %v50_v2  ;;  %114 = vmatpush.msra.mxu1 %v50_v2 }
  0x13   :  { %79 = vmatpush.msra.mxu0 %v49_v3  ;;  %115 = vmatpush.msra.mxu1 %v49_v3 }
  0x14   :  { %110 = vmatmul.msk.f32.vlgmr.msra.gmra.mxu0 %vm57_vm0, %v47_v4  ;;  %111 = vmatmul.msk.f32.vlgmr.msra.gmra.mxu1 %vm57_vm0, %v48_v5 }
  0x91   :  { %v81_v7 = vpop.f32.mrf.mxu0  ;;  %v84_v8 = vpop.f32.mrf.mxu1 }
  0x92   :  { %v82_v9 = vadd.f32 %v121_v6, %v81_v7  ;;  %v85_v10 = vadd.f32 %v121_v6, %v84_v8 }
  0x94   :  { %88 = vst.msk [vmem:[#allocation7] sm:$0xff] %vm87_vm1, %v82_v9 }
  0x95   :  { %89 = vst.msk [vmem:[#allocation7 + $0x8] sm:$0xff] %vm87_vm1, %v85_v10 }
  0x96   :  { %102 = dma.vmem_to_hbm [thread:$0]  %s95_s25, 256, %s97_s28, [#allocation4], %s201_s20, %s201_s20, %s202_s21  }
  0x97   :  { %198 = dma.done.wait [#allocation4], 256  }
  0x98   :  { %199 = vsyncadd [#allocation4], 4294967040 }
  0x99   :  { %107 = vsyncpa [#allocation3], 1 }
  0x9a   :  { %108 = vsyncpa [#allocation6], 1 }
  0x9b   :  { %109 = vsyncpa [#allocation4], 1 }

</bundles_post_ra>
